<compile_context>
chip_gen: v7x
topology: tpu7x:2x2x1
jax: 0.10.0
libtpu: 0.0.40
codegen_flags: <defaults>
</compile_context>

<pallas_src>
import functools

import jax
import jax.numpy as jnp
from jax.experimental import pallas as pl
from jax.experimental.pallas import tpu as pltpu

LANE = 128  # TPU lane width


def _round_up(n, m):
    return ((n + m - 1) // m) * m


def dqn_kernel(x_ref, w1_ref, b1_ref, w2_ref, b2_ref, w3_ref, b3_ref, o_ref):
    # Hoist bias loads (f32) once per grid step.
    b1 = b1_ref[...]
    b2 = b2_ref[...]
    b3 = b3_ref[...]

    x = x_ref[...]  # (TB, 128) bf16, zero-padded lanes contribute nothing.

    # fc1 + ReLU (bf16 MXU, f32 accumulate)
    h1 = jnp.dot(x, w1_ref[...], preferred_element_type=jnp.float32)
    h1 = jnp.maximum(h1 + b1, 0.0)

    # fc2 + ReLU
    h2 = jnp.dot(h1.astype(jnp.bfloat16), w2_ref[...],
                 preferred_element_type=jnp.float32)
    h2 = jnp.maximum(h2 + b2, 0.0)

    # fc3 (no activation)
    y = jnp.dot(h2.astype(jnp.bfloat16), w3_ref[...],
                preferred_element_type=jnp.float32)
    o_ref[...] = (y + b3).astype(o_ref.dtype)
    # TODO(synk): if the consumer is greedy action selection, fuse a masked argmax
    # over the first out_size lanes here and emit an int32 action per row.


def dqn_forward(x, params, *, block_b=256):
    """Full DQN forward pass (fc1+ReLU -> fc2+ReLU -> fc3) in one Pallas kernel.

    x: (B, input_size) float32
    params: dict with w1 (in,128), b1 (1,128), w2 (128,128), b2 (1,128),
            w3 (128,out), b3 (1,out)   (all float32)
    Returns: (B, out_size) float32 Q-values.
    """
    B, in_size = x.shape
    hidden = params["w1"].shape[1]
    out_size = params["w3"].shape[1]

    # Lane-dense padded shapes.
    k_pad = _round_up(in_size, LANE)
    n_pad = _round_up(out_size, LANE)
    # Batch tile: multiple of 16 sublanes (bf16), capped at block_b (MXU M-dim fill).
    tb = min(block_b, _round_up(B, 16))
    b_pad = _round_up(B, tb)

    f32 = jnp.float32
    bf16 = jnp.bfloat16

    # Zero-pad: padded K rows of w1 and padded N cols of w3/b3 contribute nothing.
    xp = jnp.zeros((b_pad, k_pad), bf16).at[:B, :in_size].set(x.astype(bf16))
    w1 = jnp.zeros((k_pad, hidden), bf16).at[:in_size, :].set(
        params["w1"].astype(bf16))
    w2 = params["w2"].astype(bf16)
    w3 = jnp.zeros((hidden, n_pad), bf16).at[:, :out_size].set(
        params["w3"].astype(bf16))
    b1 = params["b1"].astype(f32)
    b2 = params["b2"].astype(f32)
    b3 = jnp.zeros((1, n_pad), f32).at[:, :out_size].set(params["b3"].astype(f32))

    # Weights/biases pinned at block (0, 0): VMEM-resident across all batch tiles.
    pinned = lambda arr: pl.BlockSpec(arr.shape, lambda i: (0, 0))

    out = pl.pallas_call(
        dqn_kernel,
        out_shape=jax.ShapeDtypeStruct((b_pad, n_pad), f32),
        grid=(b_pad // tb,),
        in_specs=[
            pl.BlockSpec((tb, k_pad), lambda i: (i, 0)),   # x tiles over batch
            pinned(w1), pinned(b1),
            pinned(w2), pinned(b2),
            pinned(w3), pinned(b3),
        ],
        out_specs=pl.BlockSpec((tb, n_pad), lambda i: (i, 0)),
        compiler_params=pltpu.CompilerParams(
            dimension_semantics=("parallel",)),
    )(xp, w1, b1, w2, b2, w3, b3)

    return out[:B, :out_size]


def init_params(key, input_size, output_size, hidden=128):
    """Deterministic init mimicking PyTorch nn.Linear default (uniform +-1/sqrt(fan_in))."""
    ks = jax.random.split(key, 6)

    def lin(kw, kb, fan_in, fan_out):
        bound = 1.0 / jnp.sqrt(jnp.float32(fan_in))
        w = jax.random.uniform(kw, (fan_in, fan_out), jnp.float32, -bound, bound)
        b = jax.random.uniform(kb, (1, fan_out), jnp.float32, -bound, bound)
        return w, b

    w1, b1 = lin(ks[0], ks[1], input_size, hidden)
    w2, b2 = lin(ks[2], ks[3], hidden, hidden)
    w3, b3 = lin(ks[4], ks[5], hidden, output_size)
    return {"w1": w1, "b1": b1, "w2": w2, "b2": b2, "w3": w3, "b3": b3}


def dqn_reference_bf16(x, p):
    """Reference mirroring the kernel's bf16-feed / f32-accumulate arithmetic."""
    bf16, f32 = jnp.bfloat16, jnp.float32
    h1 = jnp.maximum(
        jnp.dot(x.astype(bf16), p["w1"].astype(bf16),
                preferred_element_type=f32) + p["b1"], 0.0)
    h2 = jnp.maximum(
        jnp.dot(h1.astype(bf16), p["w2"].astype(bf16),
                preferred_element_type=f32) + p["b2"], 0.0)
    return jnp.dot(h2.astype(bf16), p["w3"].astype(bf16),
                   preferred_element_type=f32) + p["b3"]


def dqn_reference_f32(x, p):
    h1 = jnp.maximum(x @ p["w1"] + p["b1"], 0.0)
    h2 = jnp.maximum(h1 @ p["w2"] + p["b2"], 0.0)
    return h2 @ p["w3"] + p["b3"]


if __name__ == "__main__":
    key = jax.random.PRNGKey(0)
    k_x, k_p = jax.random.split(key)

    batch = 8
    input_size = 11   # typical Snake-DQN state vector length
    output_size = 4   # 4 movement actions

    x = jax.random.normal(k_x, (batch, input_size), jnp.float32)
    params = init_params(k_p, input_size, output_size)

    out = dqn_forward(x, params)
    out = jax.block_until_ready(out)

    assert out.shape == (batch, output_size)

    ref_bf16 = dqn_reference_bf16(x, params)
    ref_f32 = dqn_reference_f32(x, params)
    # Tight check against a bf16-feed reference (same arithmetic as the kernel).
    assert jnp.allclose(out, ref_bf16, atol=2e-2, rtol=2e-2)
    # Loose sanity check against the full-f32 PyTorch-equivalent math.
    assert jnp.allclose(out, ref_f32, atol=5e-2, rtol=5e-2)

    print("KERNEL_OK")
</pallas_src>

<mosaic_0001>
module attributes {stable_mosaic.version = 11 : i64} {
  func.func @dqn_kernel(%arg0: i32, %arg1: memref<16x128xbf16, #tpu.memory_space<vmem>>, %arg2: memref<128x128xbf16, #tpu.memory_space<vmem>>, %arg3: memref<1x128xf32, #tpu.memory_space<vmem>>, %arg4: memref<128x128xbf16, #tpu.memory_space<vmem>>, %arg5: memref<1x128xf32, #tpu.memory_space<vmem>>, %arg6: memref<128x128xbf16, #tpu.memory_space<vmem>>, %arg7: memref<1x128xf32, #tpu.memory_space<vmem>>, %arg8: memref<16x128xf32, #tpu.memory_space<vmem>>) attributes {dimension_semantics = [#tpu.dimension_semantics<parallel>], iteration_bounds = array<i64: 1>, scalar_prefetch = 0 : i64, scratch_operands = 0 : i64, tpu.core_type = #tpu.core_type<tc>, window_params = [{transform_indices = @transform_0, window_bounds = array<i64: 16, 128>}, {pipeline_mode = #tpu.pipeline_mode<synchronous>, transform_indices = @transform_1, window_bounds = array<i64: 128, 128>}, {pipeline_mode = #tpu.pipeline_mode<synchronous>, transform_indices = @transform_2, window_bounds = array<i64: 1, 128>}, {pipeline_mode = #tpu.pipeline_mode<synchronous>, transform_indices = @transform_3, window_bounds = array<i64: 128, 128>}, {pipeline_mode = #tpu.pipeline_mode<synchronous>, transform_indices = @transform_4, window_bounds = array<i64: 1, 128>}, {pipeline_mode = #tpu.pipeline_mode<synchronous>, transform_indices = @transform_5, window_bounds = array<i64: 128, 128>}, {pipeline_mode = #tpu.pipeline_mode<synchronous>, transform_indices = @transform_6, window_bounds = array<i64: 1, 128>}, {transform_indices = @transform_7, window_bounds = array<i64: 16, 128>}]} {
    %c0 = arith.constant 0 : index
    %c0_0 = arith.constant 0 : index
    %0 = vector.load %arg3[%c0, %c0_0] : memref<1x128xf32, #tpu.memory_space<vmem>>, vector<1x128xf32>
    %c0_1 = arith.constant 0 : index
    %c0_2 = arith.constant 0 : index
    %1 = vector.load %arg5[%c0_1, %c0_2] : memref<1x128xf32, #tpu.memory_space<vmem>>, vector<1x128xf32>
    %c0_3 = arith.constant 0 : index
    %c0_4 = arith.constant 0 : index
    %2 = vector.load %arg7[%c0_3, %c0_4] : memref<1x128xf32, #tpu.memory_space<vmem>>, vector<1x128xf32>
    %c0_5 = arith.constant 0 : index
    %c0_6 = arith.constant 0 : index
    %3 = vector.load %arg1[%c0_5, %c0_6] : memref<16x128xbf16, #tpu.memory_space<vmem>>, vector<16x128xbf16>
    %c0_7 = arith.constant 0 : index
    %c0_8 = arith.constant 0 : index
    %4 = vector.load %arg2[%c0_7, %c0_8] : memref<128x128xbf16, #tpu.memory_space<vmem>>, vector<128x128xbf16>
    %cst = arith.constant dense<0.000000e+00> : vector<16x128xf32>
    %5 = tpu.matmul %3, %4, %cst {dimension_numbers = #tpu.dot_dimension_numbers<[1], [0], [0], [1], [0, 0, 1, 1], [], []>} : vector<16x128xbf16>, vector<128x128xbf16>, vector<16x128xf32> -> vector<16x128xf32>
    %6 = vector.broadcast %0 : vector<1x128xf32> to vector<16x128xf32>
    %7 = arith.addf %5, %6 : vector<16x128xf32>
    %cst_9 = arith.constant 0.000000e+00 : f32
    %8 = vector.broadcast %cst_9 : f32 to vector<16x128xf32>
    %9 = arith.maximumf %7, %8 : vector<16x128xf32>
    %10 = arith.truncf %9 : vector<16x128xf32> to vector<16x128xbf16>
    %c0_10 = arith.constant 0 : index
    %c0_11 = arith.constant 0 : index
    %11 = vector.load %arg4[%c0_10, %c0_11] : memref<128x128xbf16, #tpu.memory_space<vmem>>, vector<128x128xbf16>
    %cst_12 = arith.constant dense<0.000000e+00> : vector<16x128xf32>
    %12 = tpu.matmul %10, %11, %cst_12 {dimension_numbers = #tpu.dot_dimension_numbers<[1], [0], [0], [1], [0, 0, 1, 1], [], []>} : vector<16x128xbf16>, vector<128x128xbf16>, vector<16x128xf32> -> vector<16x128xf32>
    %13 = vector.broadcast %1 : vector<1x128xf32> to vector<16x128xf32>
    %14 = arith.addf %12, %13 : vector<16x128xf32>
    %cst_13 = arith.constant 0.000000e+00 : f32
    %15 = vector.broadcast %cst_13 : f32 to vector<16x128xf32>
    %16 = arith.maximumf %14, %15 : vector<16x128xf32>
    %17 = arith.truncf %16 : vector<16x128xf32> to vector<16x128xbf16>
    %c0_14 = arith.constant 0 : index
    %c0_15 = arith.constant 0 : index
    %18 = vector.load %arg6[%c0_14, %c0_15] : memref<128x128xbf16, #tpu.memory_space<vmem>>, vector<128x128xbf16>
    %cst_16 = arith.constant dense<0.000000e+00> : vector<16x128xf32>
    %19 = tpu.matmul %17, %18, %cst_16 {dimension_numbers = #tpu.dot_dimension_numbers<[1], [0], [0], [1], [0, 0, 1, 1], [], []>} : vector<16x128xbf16>, vector<128x128xbf16>, vector<16x128xf32> -> vector<16x128xf32>
    %20 = vector.broadcast %2 : vector<1x128xf32> to vector<16x128xf32>
    %21 = arith.addf %19, %20 : vector<16x128xf32>
    %c0_17 = arith.constant 0 : index
    %c0_18 = arith.constant 0 : index
    %22 = vector.load %arg8[%c0_17, %c0_18] : memref<16x128xf32, #tpu.memory_space<vmem>>, vector<16x128xf32>
    tpu.vector_store %arg8[%c0_17, %c0_18], %21 {strides = array<i32>} : memref<16x128xf32, #tpu.memory_space<vmem>>, vector<16x128xf32>,
    return
  }
  func.func @transform_0(%arg0: i32) -> (i32, i32) {
    %c0_i32 = arith.constant 0 : i32
    %c0_i32_0 = arith.constant 0 : i32
    return %arg0, %c0_i32 : i32, i32
  }
  func.func @transform_1(%arg0: i32) -> (i32, i32) {
    %c0_i32 = arith.constant 0 : i32
    %c0_i32_0 = arith.constant 0 : i32
    %c0_i32_1 = arith.constant 0 : i32
    return %c0_i32, %c0_i32_0 : i32, i32
  }
  func.func @transform_2(%arg0: i32) -> (i32, i32) {
    %c0_i32 = arith.constant 0 : i32
    %c0_i32_0 = arith.constant 0 : i32
    %c0_i32_1 = arith.constant 0 : i32
    return %c0_i32, %c0_i32_0 : i32, i32
  }
  func.func @transform_3(%arg0: i32) -> (i32, i32) {
    %c0_i32 = arith.constant 0 : i32
    %c0_i32_0 = arith.constant 0 : i32
    %c0_i32_1 = arith.constant 0 : i32
    return %c0_i32, %c0_i32_0 : i32, i32
  }
  func.func @transform_4(%arg0: i32) -> (i32, i32) {
    %c0_i32 = arith.constant 0 : i32
    %c0_i32_0 = arith.constant 0 : i32
    %c0_i32_1 = arith.constant 0 : i32
    return %c0_i32, %c0_i32_0 : i32, i32
  }
  func.func @transform_5(%arg0: i32) -> (i32, i32) {
    %c0_i32 = arith.constant 0 : i32
    %c0_i32_0 = arith.constant 0 : i32
    %c0_i32_1 = arith.constant 0 : i32
    return %c0_i32, %c0_i32_0 : i32, i32
  }
  func.func @transform_6(%arg0: i32) -> (i32, i32) {
    %c0_i32 = arith.constant 0 : i32
    %c0_i32_0 = arith.constant 0 : i32
    %c0_i32_1 = arith.constant 0 : i32
    return %c0_i32, %c0_i32_0 : i32, i32
  }
  func.func @transform_7(%arg0: i32) -> (i32, i32) {
    %c0_i32 = arith.constant 0 : i32
    %c0_i32_0 = arith.constant 0 : i32
    return %arg0, %c0_i32 : i32, i32
  }
}

</mosaic_0001>

<bundles_post_ra>
// kernel: tpu_custom_call.1
= control target key start
LH: loop header
LB: loop body
LE: loop exit
PB: predicated region body
PF: predicated region fallthrough
CT: control target
= control target key end

     0   :  { %12 = vsyncpa [#allocation3], 0  ;;  %s899_s0 = inlined_call_operand.hbm [shape: bf16[16,128], index: 0, kind: input, shape index: {}]   ;;  %s900_s1 = inlined_call_operand.hbm [shape: bf16[128,128], index: 1, kind: input, shape index: {}]   ;;  %s901_s2 = inlined_call_operand.vmem [shape: f32[1,128], index: 2, kind: input, shape index: {}]   ;;  %s902_s3 = inlined_call_operand.hbm [shape: bf16[128,128], index: 3, kind: input, shape index: {}]   ;;  %s903_s4 = inlined_call_operand.vmem [shape: f32[1,128], index: 4, kind: input, shape index: {}]   ;;  %s904_s5 = inlined_call_operand.hbm [shape: bf16[128,128], index: 5, kind: input, shape index: {}]   ;;  %s905_s6 = inlined_call_operand.vmem [shape: f32[1,128], index: 6, kind: input, shape index: {}]   ;;  %s906_s7 = inlined_call_operand.hbm [shape: f32[16,128], index: 7, kind: output, shape index: {}]  }
   0x1   :  { %13 = vsyncpa [#allocation6], 0 }
   0x2   :  { %14 = vsyncpa [#allocation9], 0 }
   0x3   :  { %15 = vsyncpa [#allocation4], 0  ;;  %s723_s24 = smov [#allocation5]   ;;  %s724_s26 = smov [#allocation2]  }
   0x4   :  { %s33_s25 = sshll.u32 %s723_s24, 4  ;;  %s21_s27 = sshll.u32 %s724_s26, 4  ;;  %s34_s25 = int_to_ptr.vmem [resolvable:$true] %s33_s25  ;;  %s774_s27 = int_to_ptr.vmem [resolvable:$true] %s21_s27 }
   0x5   :  { %s605_s30 = scalar_lea.hbm %s900_s1, 1024 }
   0x6   :  { %p606_p0 = scmp.ne.s32.totalorder %s900_s1, %s605_s30  ;;  %p609_p1 = scmp.lt.u32.totalorder %s605_s30, %s900_s1 }
   0x8   :  { %p611_p2 = pnand %p609_p1, %p606_p0 }
   0xa   :  { %614 = shalt.err (!%p611_p2)
}
   0xb   :  { %s615_s12 = scalar_lea.vmem %s34_s25, 1024  ;;  %p620_p4 = scmp.lt.s32.totalorder %s34_s25, %s34_s25 }
   0xc   :  { %p616_p3 = scmp.ne.s32.totalorder %s34_s25, %s615_s12  ;;  %p621_p5 = scmp.lt.s32.totalorder %s615_s12, %s615_s12 }
   0xe   :  { %p622_p6 = por %p621_p5, %p620_p4 }
  0x10   :  { %p623_p7 = pnand %p622_p6, %p616_p3 }
  0x12   :  { %626 = shalt.err (!%p623_p7)
}
  0x13   :  { %s725_s13 = smov 64   ;;  %s726_s14 = smov 4  }
  0x14   :  { %39 = dma.hbm_to_vmem [thread:$0]  %s900_s1, 1024, %s34_s25, [#allocation6], %s725_s13, %s725_s13, %s726_s14  }
  0x15   :  { %s627_s19 = scalar_lea.hbm %s899_s0, 128 }
  0x16   :  { %p628_p8 = scmp.ne.s32.totalorder %s899_s0, %s627_s19  ;;  %p631_p9 = scmp.lt.u32.totalorder %s627_s19, %s899_s0 }
  0x18   :  { %p633_p10 = pnand %p631_p9, %p628_p8 }
  0x1a   :  { %636 = shalt.err (!%p633_p10)
}
  0x1b   :  { %s637_s24 = scalar_lea.vmem %s774_s27, 128  ;;  %p642_p12 = scmp.lt.s32.totalorder %s774_s27, %s774_s27 }
  0x1c   :  { %p638_p11 = scmp.ne.s32.totalorder %s774_s27, %s637_s24  ;;  %p643_p13 = scmp.lt.s32.totalorder %s637_s24, %s637_s24 }
  0x1e   :  { %p644_p0 = por %p643_p13, %p642_p12 }
  0x20   :  { %p645_p1 = pnand %p644_p0, %p638_p11 }
  0x22   :  { %648 = shalt.err (!%p645_p1)
}
  0x23   :  { %27 = dma.hbm_to_vmem [thread:$0]  %s899_s0, 128, %s774_s27, [#allocation3], %s725_s13, %s725_s13, %s726_s14  }
  0x24   :  { %s727_s26 = smov [#allocation7]   ;;  %s728_s29 = smov [#allocation8]  }
  0x25   :  { %s47_s28 = sshll.u32 %s727_s26, 4  ;;  %s61_s30 = sshll.u32 %s728_s29, 4  ;;  %s48_s28 = int_to_ptr.vmem [resolvable:$true] %s47_s28  ;;  %s811_s30 = int_to_ptr.vmem [resolvable:$true] %s61_s30 }
  0x26   :  { %s649_s10 = scalar_lea.hbm %s902_s3, 1024 }
  0x27   :  { %p650_p2 = scmp.ne.s32.totalorder %s902_s3, %s649_s10  ;;  %p653_p3 = scmp.lt.u32.totalorder %s649_s10, %s902_s3 }
  0x29   :  { %p655_p4 = pnand %p653_p3, %p650_p2 }
  0x2b   :  { %658 = shalt.err (!%p655_p4)
}
  0x2c   :  { %s659_s0 = scalar_lea.vmem %s48_s28, 1024  ;;  %p664_p6 = scmp.lt.s32.totalorder %s48_s28, %s48_s28 }
  0x2d   :  { %p660_p5 = scmp.ne.s32.totalorder %s48_s28, %s659_s0  ;;  %p665_p7 = scmp.lt.s32.totalorder %s659_s0, %s659_s0 }
  0x2f   :  { %p666_p8 = por %p665_p7, %p664_p6 }
  0x31   :  { %p667_p9 = pnand %p666_p8, %p660_p5 }
  0x33   :  { %670 = shalt.err (!%p667_p9)
}
  0x34   :  { %53 = dma.hbm_to_vmem [thread:$0]  %s902_s3, 1024, %s48_s28, [#allocation6], %s725_s13, %s725_s13, %s726_s14  }
  0x35   :  { %s671_s20 = scalar_lea.hbm %s904_s5, 1024 }
  0x36   :  { %p672_p10 = scmp.ne.s32.totalorder %s904_s5, %s671_s20  ;;  %p675_p11 = scmp.lt.u32.totalorder %s671_s20, %s904_s5 }
  0x38   :  { %p677_p12 = pnand %p675_p11, %p672_p10 }
  0x3a   :  { %680 = shalt.err (!%p677_p12)
}
  0x3b   :  { %s681_s1 = scalar_lea.vmem %s811_s30, 1024  ;;  %p686_p0 = scmp.lt.s32.totalorder %s811_s30, %s811_s30 }
  0x3c   :  { %p682_p13 = scmp.ne.s32.totalorder %s811_s30, %s681_s1  ;;  %p687_p1 = scmp.lt.s32.totalorder %s681_s1, %s681_s1 }
  0x3e   :  { %p688_p2 = por %p687_p1, %p686_p0 }
  0x40   :  { %p689_p3 = pnand %p688_p2, %p682_p13 }
  0x42   :  { %692 = shalt.err (!%p689_p3)
}
  0x43   :  { %67 = dma.hbm_to_vmem [thread:$0]  %s904_s5, 1024, %s811_s30, [#allocation9], %s725_s13, %s725_s13, %s726_s14  }
  0x44   :  { %715 = dma.done.wait [#allocation3], 128  }
  0x45   :  { %716 = vsyncadd [#allocation3], 4294967168 }
  0x46   :  { %717 = dma.done.wait [#allocation6], 2048  }
  0x47   :  { %718 = vsyncadd [#allocation6], 4294965248 }
  0x48   :  { %719 = dma.done.wait [#allocation9], 1024  }
  0x49   :  { %720 = vsyncadd [#allocation9], 4294966272  ;;  %v729_v0 = vmov 0.0   ;;  %vm730_vm0 = vmmov 0   ;;  %v580_v1 = vld [vmem:[#allocation5] sm:$0xff]   ;;  %v581_v2 = vld [vmem:[#allocation5 + $0x8] sm:$0xff]  }
  0x4a   :  { %509 = vmatprep.subr.bf16.mxu0 %v729_v0  ;;  %525 = vmatprep.mubr.msk.bf16.mxu0 %vm730_vm0, %v729_v0  ;;  %v582_v3 = vld [vmem:[#allocation5 + $0x10] sm:$0xff]   ;;  %v589_v4 = vld [vmem:[#allocation7] sm:$0xff]   ;;  %v583_v5 = vld [vmem:[#allocation5 + $0x18] sm:$0xff]   ;;  %s731_s29 = smov [#allocation10]  }
  0x4b   :  { %529 = vmatprep.subr.bf16.mxu1 %v729_v0  ;;  %545 = vmatprep.mubr.msk.bf16.mxu1 %vm730_vm0, %v729_v0  ;;  %v590_v6 = vld [vmem:[#allocation7 + $0x8] sm:$0xff]   ;;  %v584_v7 = vld [vmem:[#allocation5 + $0x20] sm:$0xff]   ;;  %v591_v8 = vld [vmem:[#allocation7 + $0x10] sm:$0xff]   ;;  %s440_s30 = sshll.u32 %s731_s29, 4  ;;  %s441_s30 = int_to_ptr.vmem [resolvable:$true] %s440_s30 }
  0x4c   :  { %510 = vmatpush3.bf16.msra.mxu0 %v580_v1  ;;  %530 = vmatpush3.bf16.msra.mxu1 %v589_v4  ;;  %v585_v9 = vld [vmem:[#allocation5 + $0x28] sm:$0xff]   ;;  %v592_v10 = vld [vmem:[#allocation7 + $0x18] sm:$0xff]   ;;  %v586_v11 = vld [vmem:[#allocation5 + $0x30] sm:$0xff]   ;;  %p698_p5 = scmp.lt.s32.totalorder %s441_s30, %s441_s30 }
  0x4d   :  { %511 = vmatprep.subr.bf16.mxu0 %v729_v0  ;;  %531 = vmatprep.subr.bf16.mxu1 %v729_v0  ;;  %v593_v12 = vld [vmem:[#allocation7 + $0x20] sm:$0xff]   ;;  %v587_v13 = vld [vmem:[#allocation5 + $0x38] sm:$0xff]   ;;  %v594_v14 = vld [vmem:[#allocation7 + $0x28] sm:$0xff]  }
  0x4e   :  { %v588_v15 = vld [vmem:[#allocation2] sm:$0xff]   ;;  %v595_v16 = vld [vmem:[#allocation7 + $0x30] sm:$0xff]   ;;  %v597_v18 = vld [vmem:[#allocation8] sm:$0xff]  }
  0x4f   :  { %v596_v17 = vld [vmem:[#allocation7 + $0x38] sm:$0xff]   ;;  %v598_v19 = vld [vmem:[#allocation8 + $0x8] sm:$0xff]   ;;  %v599_v20 = vld [vmem:[#allocation8 + $0x10] sm:$0xff]  }
  0x50   :  { %512 = vmatpush3.bf16.msra.mxu0 %v581_v2  ;;  %532 = vmatpush3.bf16.msra.mxu1 %v590_v6  ;;  %v600_v21 = vld [vmem:[#allocation8 + $0x18] sm:$0xff]   ;;  %v601_v22 = vld [vmem:[#allocation8 + $0x20] sm:$0xff]   ;;  %v602_v23 = vld [vmem:[#allocation8 + $0x28] sm:$0xff]  }
  0x51   :  { %513 = vmatprep.subr.bf16.mxu0 %v729_v0  ;;  %533 = vmatprep.subr.bf16.mxu1 %v729_v0  ;;  %v454_v24 = vld [vmem:[%s901_s2] ss:$0 sm:$0xff]  ;;  %v603_v34 = vld [vmem:[#allocation8 + $0x30] sm:$0xff]  }
  0x52   :  { %v604_v35 = vld [vmem:[#allocation8 + $0x38] sm:$0xff]  }
  0x53   :  { %v464_v36 = vld [vmem:[%s903_s4] ss:$0 sm:$0xff]  ;;  %s693_s4 = scalar_lea.vmem %s441_s30, 256 }
  0x54   :  { %514 = vmatpush3.bf16.msra.mxu0 %v582_v3  ;;  %534 = vmatpush3.bf16.msra.mxu1 %v591_v8  ;;  %v473_v46 = vld [vmem:[%s905_s6] ss:$0 sm:$0xff]  ;;  %p694_p4 = scmp.ne.s32.totalorder %s441_s30, %s693_s4  ;;  %p699_p6 = scmp.lt.s32.totalorder %s693_s4, %s693_s4 }
  0x55   :  { %515 = vmatprep.subr.bf16.mxu0 %v729_v0  ;;  %535 = vmatprep.subr.bf16.mxu1 %v729_v0 }
  0x56   :  { %p700_p7 = por %p699_p6, %p698_p5 }
  0x58   :  { %516 = vmatpush3.bf16.msra.mxu0 %v583_v5  ;;  %536 = vmatpush3.bf16.msra.mxu1 %v592_v10  ;;  %p701_p8 = pnand %p700_p7, %p694_p4 }
  0x59   :  { %517 = vmatprep.subr.bf16.mxu0 %v729_v0  ;;  %537 = vmatprep.subr.bf16.mxu1 %v729_v0 }
  0x5c   :  { %518 = vmatpush3.bf16.msra.mxu0 %v584_v7  ;;  %538 = vmatpush3.bf16.msra.mxu1 %v593_v12 }
  0x5d   :  { %519 = vmatprep.subr.bf16.mxu0 %v729_v0  ;;  %539 = vmatprep.subr.bf16.mxu1 %v729_v0 }
  0x60   :  { %520 = vmatpush3.bf16.msra.mxu0 %v585_v9  ;;  %540 = vmatpush3.bf16.msra.mxu1 %v594_v14 }
  0x61   :  { %521 = vmatprep.subr.bf16.mxu0 %v729_v0  ;;  %541 = vmatprep.subr.bf16.mxu1 %v729_v0 }
  0x64   :  { %522 = vmatpush3.bf16.msra.mxu0 %v586_v11  ;;  %542 = vmatpush3.bf16.msra.mxu1 %v595_v16 }
  0x65   :  { %523 = vmatprep.subr.bf16.mxu0 %v729_v0  ;;  %543 = vmatprep.subr.bf16.mxu1 %v729_v0 }
  0x68   :  { %524 = vmatpush3.bf16.msra.mxu0 %v587_v13  ;;  %544 = vmatpush3.bf16.msra.mxu1 %v596_v17 }
  0x69   :  { %549 = vmatprep.subr.bf16.mxu0 %v729_v0 }
  0x6b   :  { %526 = vmatmul.mubr.bf16.vlgmr.msra.gmra.mrb[0].mxu0 %v588_v15 }
  0x6c   :  { %565 = vmatprep.mubr.msk.bf16.mxu0 %vm730_vm0, %v729_v0  ;;  %550 = vmatpush3.bf16.msra.mxu0 %v597_v18 }
  0x6d   :  { %551 = vmatprep.subr.bf16.mxu0 %v729_v0 }
  0x70   :  { %552 = vmatpush3.bf16.msra.mxu0 %v598_v19 }
  0x71   :  { %553 = vmatprep.subr.bf16.mxu0 %v729_v0 }
  0x74   :  { %554 = vmatpush3.bf16.msra.mxu0 %v599_v20 }
  0x75   :  { %555 = vmatprep.subr.bf16.mxu0 %v729_v0 }
  0x78   :  { %556 = vmatpush3.bf16.msra.mxu0 %v600_v21 }
  0x79   :  { %557 = vmatprep.subr.bf16.mxu0 %v729_v0 }
  0x7c   :  { %558 = vmatpush3.bf16.msra.mxu0 %v601_v22 }
  0x7d   :  { %559 = vmatprep.subr.bf16.mxu0 %v729_v0 }
  0x80   :  { %560 = vmatpush3.bf16.msra.mxu0 %v602_v23 }
  0x81   :  { %561 = vmatprep.subr.bf16.mxu0 %v729_v0 }
  0x84   :  { %562 = vmatpush3.bf16.msra.mxu0 %v603_v34 }
  0x85   :  { %563 = vmatprep.subr.bf16.mxu0 %v729_v0 }
  0x88   :  { %564 = vmatpush3.bf16.msra.mxu0 %v604_v35 }
 0x13e   :  { %v198_v25 = vpop.f32.mrb[0].mxu0 }
 0x13f   :  { %v199_v26 = vadd.f32 %v454_v24, %v198_v25  ;;  %v527_v27 = vpop.f32.mrb[1].mxu0 }
 0x140   :  { %v201_v28 = vpop.f32.mrb[2].mxu0 }
 0x141   :  { %v202_v29 = vadd.f32 %v454_v24, %v201_v28  ;;  %v528_v30 = vpop.f32.mrb[3].mxu0  ;;  %v205_v31 = vmax.f32 %v199_v26, 0.0 }
 0x143   :  { %v206_v32 = vmax.f32 %v202_v29, 0.0 }
 0x145   :  { %v207_v33 = vpack.c.bf16 %v206_v32, %v205_v31 }
 0x147   :  { %546 = vmatmul.mubr.bf16.vlgmr.msra.gmra.mrb[0].mxu1 %v207_v33 }
 0x21a   :  { %v312_v37 = vpop.f32.mrb[0].mxu1 }
 0x21b   :  { %v313_v38 = vadd.f32 %v464_v36, %v312_v37  ;;  %v547_v39 = vpop.f32.mrb[1].mxu1 }
 0x21c   :  { %v315_v40 = vpop.f32.mrb[2].mxu1 }
 0x21d   :  { %v316_v41 = vadd.f32 %v464_v36, %v315_v40  ;;  %v548_v42 = vpop.f32.mrb[3].mxu1  ;;  %v319_v43 = vmax.f32 %v313_v38, 0.0 }
 0x21f   :  { %v320_v44 = vmax.f32 %v316_v41, 0.0 }
 0x221   :  { %v321_v45 = vpack.c.bf16 %v320_v44, %v319_v43 }
 0x223   :  { %566 = vmatmul.mubr.bf16.vlgmr.msra.gmra.mrb[4].mxu0 %v321_v45 }
 0x2f6   :  { %v426_v47 = vpop.f32.mrb[4].mxu0 }
 0x2f7   :  { %v427_v48 = vadd.f32 %v473_v46, %v426_v47  ;;  %v567_v49 = vpop.f32.mrb[5].mxu0 }
 0x2f8   :  { %v429_v50 = vpop.f32.mrb[6].mxu0 }
 0x2f9   :  { %433 = vst [vmem:[#allocation10] sm:$0xff] %v427_v48  ;;  %v430_v51 = vadd.f32 %v473_v46, %v429_v50  ;;  %v568_v52 = vpop.f32.mrb[7].mxu0 }
 0x2fb   :  { %434 = vst [vmem:[#allocation10 + $0x8] sm:$0xff] %v430_v51 }
 0x2fc   :  { %704 = shalt.err (!%p701_p8)
}
 0x2fd   :  { %s705_s9 = scalar_lea.hbm %s906_s7, 256 }
 0x2fe   :  { %p706_p9 = scmp.ne.s32.totalorder %s906_s7, %s705_s9  ;;  %p709_p10 = scmp.lt.u32.totalorder %s705_s9, %s906_s7 }
 0x300   :  { %p711_p11 = pnand %p709_p10, %p706_p9 }
 0x302   :  { %714 = shalt.err (!%p711_p11)
}
 0x303   :  { %s732_s16 = smov 128   ;;  %s733_s0 = smov 8  }
 0x304   :  { %446 = dma.vmem_to_hbm [thread:$0]  %s441_s30, 256, %s906_s7, [#allocation4], %s732_s16, %s732_s16, %s733_s0  }
 0x305   :  { %721 = dma.done.wait [#allocation4], 256  }
 0x306   :  { %722 = vsyncadd [#allocation4], 4294967040 }
 0x307   :  { %450 = vsyncpa [#allocation3], 1 }
 0x308   :  { %451 = vsyncpa [#allocation6], 1 }
 0x309   :  { %452 = vsyncpa [#allocation9], 1 }
 0x30a   :  { %453 = vsyncpa [#allocation4], 1 }

</bundles_post_ra>
